<compile_context>
chip_gen: v7x
topology: tpu7x:2x2x1
jax: 0.10.0
libtpu: 0.0.40
codegen_flags: <defaults>
</compile_context>

<pallas_src>
import functools

import numpy as np

import jax
import jax.numpy as jnp
from jax.experimental import pallas as pl
from jax.experimental.pallas import tpu as pltpu


def _round_up(x, m):
    return ((x + m - 1) // m) * m


def afm_kernel(emb2_ref, s_ref, hp_ref, w2t_ref, b2_ref, out_ref):
    """One batch tile of the AFM attention path.

    emb2_ref : [TB, F*E]       bf16  value-weighted second-order embeddings
    s_ref    : [F*E, 2*PEpad]  bf16  fused (SI | SJ) pair-selection matrix
    hp_ref   : [PEpad, Wout]   bf16  packed H- / P-reduction matrix
    w2t_ref  : [Wout, Wout]    bf16  W2^T placed at rows [0,P), cols [off,off+P)
    b2_ref   : [1, Wout]       f32   b2 at cols [off,off+P), -1e30 elsewhere
    out_ref  : [TB, 1]         f32   attention output sum (first-order + bias
                                     are added in the wrapper)
    """
    pe_pad = s_ref.shape[-1] // 2

    # Pair operands with ONE bf16 MXU selection matmul (f32 accumulation).
    emb_ij = jnp.dot(emb2_ref[...], s_ref[...],
                     preferred_element_type=jnp.float32)        # [TB, 2*PEpad] f32
    inter = emb_ij[:, :pe_pad] * emb_ij[:, pe_pad:]             # [TB, PEpad]  f32 (VPU)

    # Fused E-axis reductions: <inter,H> at cols [0,P), <inter,P> at [off,off+P).
    hp = jnp.dot(inter.astype(jnp.bfloat16), hp_ref[...],
                 preferred_element_type=jnp.float32)            # [TB, Wout] f32

    # attention_linear_2 + softmax.  Zero rows of W2t kill the relu'd P-value
    # columns; the -1e30 bias columns get exactly-zero softmax weight.
    att_h = jnp.maximum(hp, 0.0)
    att2 = jnp.dot(att_h.astype(jnp.bfloat16), w2t_ref[...],
                   preferred_element_type=jnp.float32) + b2_ref[...]
    att2 = att2 - jnp.max(att2, axis=1, keepdims=True)
    ex = jnp.exp(att2)
    # approx reciprocal (EUP slot) ~1e-3 rel error on the weights; covered by
    # the bf16-level tolerance.
    aw = ex * pl.reciprocal(jnp.sum(ex, axis=1, keepdims=True), approx=True)

    # Attention weights live on the same columns as the P-reduction values, so
    # the weighted lane-sum needs no realignment.
    out_ref[...] = jnp.sum(hp * aw, axis=1, keepdims=True)


@functools.partial(jax.jit, static_argnames=("field_size", "embedding_size",
                                              "use_buffered_constants"))
def afm_forward(Xi, Xv, params, *, field_size, embedding_size,
                use_buffered_constants=True):
    B = Xi.shape[0]
    F, E = field_size, embedding_size
    P = F * (F - 1) // 2
    PE = P * E
    PE_pad = _round_up(PE, 128)

    # Pack H- and P-reductions into one 128-lane block when P <= 64.
    if P <= 64:
        Wout, off = 128, 64
    else:
        Wout, off = 2 * _round_up(P, 128), _round_up(P, 128)

    # ---------- first-order + bias (plain JAX; folded out of the kernel) ----------
    Xi_sq = Xi[..., 0]                                            # [B, F] int
    fidx = jnp.arange(F)[None, :]
    first = params["bias"][0] + jnp.sum(params["emb1"][fidx, Xi_sq, 0] * Xv, axis=1)

    # ---------- batch tiling: pad the tiny index/value inputs BEFORE the gather ---
    TB = min(256, _round_up(B, 8))
    B_pad = _round_up(B, TB)
    if B_pad != B:
        Xi_sq_p = jnp.pad(Xi_sq, ((0, B_pad - B), (0, 0)))
        Xv_p = jnp.pad(Xv, ((0, B_pad - B), (0, 0)))
    else:
        Xi_sq_p, Xv_p = Xi_sq, Xv

    # Second-order embedding gather (glue); stream to the kernel as bf16.
    emb2 = params["emb2"][fidx, Xi_sq_p, :] * Xv_p[..., None]     # [B_pad, F, E] f32
    emb2_flat = emb2.reshape(B_pad, F * E).astype(jnp.bfloat16)

    # ---------- constant operands (built once per compile) ------------------------
    # Fused pair-selection matrix S = [SI | SJ]; 0/1 values are exact in bf16.
    pairs = [(i, j) for i in range(F) for j in range(i + 1, F)]
    s_np = np.zeros((F * E, 2 * PE_pad), np.float32)
    for p_idx, (i, j) in enumerate(pairs):
        for e in range(E):
            s_np[i * E + e, p_idx * E + e] = 1.0
            s_np[j * E + e, PE_pad + p_idx * E + e] = 1.0
    S = jnp.asarray(s_np, dtype=jnp.bfloat16)                     # [F*E, 2*PE_pad]

    # Packed H/P reduction matrix: col p -> sum_e inter*H; col off+p -> sum_e inter*P.
    H_red = jnp.kron(jnp.eye(P, dtype=jnp.float32), params["H"].reshape(E, 1))  # [P*E, P]
    P_red = jnp.kron(jnp.eye(P, dtype=jnp.float32), params["P"].reshape(E, 1))  # [P*E, P]
    HP = (jnp.zeros((PE_pad, Wout), jnp.float32)
          .at[:PE, :P].set(H_red)
          .at[:PE, off:off + P].set(P_red)
          .astype(jnp.bfloat16))

    W2t = (jnp.zeros((Wout, Wout), jnp.float32)
           .at[:P, off:off + P].set(params["W2"].T)
           .astype(jnp.bfloat16))
    b2 = (jnp.full((1, Wout), -1e30, jnp.float32)
          .at[:, off:off + P].set(params["b2"].reshape(1, P)))

    # ---------- pallas_call --------------------------------------------------------
    grid = (B_pad // TB,)
    batch_spec = pl.BlockSpec((TB, F * E), lambda b: (b, 0))
    out_spec = pl.BlockSpec((TB, 1), lambda b: (b, 0))

    def const_spec(shape):
        if use_buffered_constants:
            # Constants never change across the grid -> single-buffered.
            return pl.BlockSpec(shape, lambda b: (0, 0), pipeline_mode=pl.Buffered(1))
        return pl.BlockSpec(shape, lambda b: (0, 0))

    # VMEM budget from the actual footprint, capped for v7x (64 MiB per-TC).
    vmem_est = (
        2 * TB * F * E * 2                                  # emb2 (double-buffered, bf16)
        + F * E * (2 * PE_pad) * 2                          # S
        + PE_pad * Wout * 2 + Wout * Wout * 2 + Wout * 4    # HP, W2t, b2
        + 2 * TB * 4                                        # out (double-buffered)
        + TB * (2 * PE_pad) * 4 * 2                         # emb_ij / inter temporaries
        + TB * Wout * 4 * 6                                 # hp / attention temporaries
    )
    vmem_limit = int(min(max(2 * vmem_est, 32 * 1024 * 1024), 48 * 1024 * 1024))

    att_sum = pl.pallas_call(
        afm_kernel,
        out_shape=jax.ShapeDtypeStruct((B_pad, 1), jnp.float32),
        grid=grid,
        in_specs=[
            batch_spec,                              # emb2_flat (streamed)
            const_spec((F * E, 2 * PE_pad)),         # S
            const_spec((PE_pad, Wout)),              # HP
            const_spec((Wout, Wout)),                # W2t
            const_spec((1, Wout)),                   # b2
        ],
        out_specs=out_spec,
        compiler_params=pltpu.CompilerParams(
            dimension_semantics=("parallel",),
            vmem_limit_bytes=vmem_limit,
        ),
    )(emb2_flat, S, HP, W2t, b2)

    return att_sum[:B, 0] + first


def afm_reference(Xi, Xv, params, *, field_size, embedding_size):
    """Pure-JAX f32 reference of the same forward path (mirrors the PyTorch module)."""
    F, E = field_size, embedding_size
    Xi_sq = Xi[..., 0]
    fidx = jnp.arange(F)[None, :]
    fm_first = params["emb1"][fidx, Xi_sq, 0] * Xv
    emb2 = params["emb2"][fidx, Xi_sq, :] * Xv[..., None]
    pairs = [(i, j) for i in range(F) for j in range(i + 1, F)]
    inter = jnp.stack([emb2[:, i, :] * emb2[:, j, :] for i, j in pairs], axis=1)
    att_tmp = jax.nn.relu(jnp.sum(inter * params["H"], -1))
    att_tmp = att_tmp @ params["W2"].T + params["b2"]
    attention_weight = jax.nn.softmax(att_tmp, axis=1)
    att_out = jnp.sum(inter * params["P"], -1) * attention_weight
    return params["bias"][0] + jnp.sum(fm_first, 1) + jnp.sum(att_out, 1)


if __name__ == "__main__":
    # small, forward-consistent shapes
    B = 8              # batch
    F = 8              # field_size
    E = 8              # embedding_size
    V = 10             # per-field vocabulary size (feature_sizes = [V] * F)
    P = F * (F - 1) // 2

    key = jax.random.PRNGKey(0)
    k = jax.random.split(key, 9)

    params = {
        "emb1": 0.2 * jax.random.normal(k[0], (F, V, 1), jnp.float32),   # first-order tables
        "emb2": 0.2 * jax.random.normal(k[1], (F, V, E), jnp.float32),   # second-order tables
        "H":    0.2 * jax.random.normal(k[2], (E,), jnp.float32),
        "P":    0.2 * jax.random.normal(k[3], (E,), jnp.float32),
        "W2":   0.2 * jax.random.normal(k[4], (P, P), jnp.float32),      # attention_linear_2 weight
        "b2":   0.1 * jax.random.normal(k[5], (P,), jnp.float32),        # attention_linear_2 bias
        "bias": 0.2 * jax.random.normal(k[6], (1,), jnp.float32),
    }

    Xi = jax.random.randint(k[7], (B, F, 1), 0, V, dtype=jnp.int32)      # index input
    Xv = jax.random.uniform(k[8], (B, F), jnp.float32)                   # value input

    try:
        out = jax.block_until_ready(
            afm_forward(Xi, Xv, params, field_size=F, embedding_size=E))
    except Exception:
        # Fallback if this jax build rejects pipeline_mode=pl.Buffered(1) on
        # pallas_call BlockSpecs: retry with default (double) buffering.
        out = jax.block_until_ready(
            afm_forward(Xi, Xv, params, field_size=F, embedding_size=E,
                        use_buffered_constants=False))

    ref = afm_reference(Xi, Xv, params, field_size=F, embedding_size=E)
    assert out.shape == (B,)
    # bf16 MXU operands + approx reciprocal in the softmax -> loosened tolerance
    assert jnp.allclose(out, ref, rtol=1e-2, atol=1e-2), (out, ref)

    print("KERNEL_OK")
</pallas_src>

<mosaic_0001>
module attributes {stable_mosaic.version = 11 : i64} {
  func.func @afm_kernel(%arg0: i32, %arg1: memref<8x64xbf16, #tpu.memory_space<vmem>>, %arg2: memref<64x512xbf16, #tpu.memory_space<vmem>>, %arg3: memref<256x128xbf16, #tpu.memory_space<vmem>>, %arg4: memref<128x128xbf16, #tpu.memory_space<vmem>>, %arg5: memref<1x128xf32, #tpu.memory_space<vmem>>, %arg6: memref<8x1xf32, #tpu.memory_space<vmem>>) attributes {dimension_semantics = [#tpu.dimension_semantics<parallel>], iteration_bounds = array<i64: 1>, scalar_prefetch = 0 : i64, scratch_operands = 0 : i64, tpu.core_type = #tpu.core_type<tc>, window_params = [{transform_indices = @transform_0, window_bounds = array<i64: 8, 64>}, {pipeline_mode = #tpu.pipeline_mode<synchronous>, transform_indices = @transform_1, window_bounds = array<i64: 64, 512>}, {pipeline_mode = #tpu.pipeline_mode<synchronous>, transform_indices = @transform_2, window_bounds = array<i64: 256, 128>}, {pipeline_mode = #tpu.pipeline_mode<synchronous>, transform_indices = @transform_3, window_bounds = array<i64: 128, 128>}, {pipeline_mode = #tpu.pipeline_mode<synchronous>, transform_indices = @transform_4, window_bounds = array<i64: 1, 128>}, {transform_indices = @transform_5, window_bounds = array<i64: 8, 1>}]} {
    %c0 = arith.constant 0 : index
    %c0_0 = arith.constant 0 : index
    %0 = vector.load %arg1[%c0, %c0_0] : memref<8x64xbf16, #tpu.memory_space<vmem>>, vector<8x64xbf16>
    %c0_1 = arith.constant 0 : index
    %c0_2 = arith.constant 0 : index
    %1 = vector.load %arg2[%c0_1, %c0_2] : memref<64x512xbf16, #tpu.memory_space<vmem>>, vector<64x512xbf16>
    %cst = arith.constant dense<0.000000e+00> : vector<8x512xf32>
    %2 = tpu.matmul %0, %1, %cst {dimension_numbers = #tpu.dot_dimension_numbers<[1], [0], [0], [1], [0, 0, 1, 1], [], []>} : vector<8x64xbf16>, vector<64x512xbf16>, vector<8x512xf32> -> vector<8x512xf32>
    %3 = vector.extract_strided_slice %2 {offsets = [0, 0], sizes = [8, 256], strides = [1, 1]} : vector<8x512xf32> to vector<8x256xf32>
    %4 = vector.extract_strided_slice %2 {offsets = [0, 256], sizes = [8, 256], strides = [1, 1]} : vector<8x512xf32> to vector<8x256xf32>
    %5 = arith.mulf %3, %4 : vector<8x256xf32>
    %6 = arith.truncf %5 : vector<8x256xf32> to vector<8x256xbf16>
    %c0_3 = arith.constant 0 : index
    %c0_4 = arith.constant 0 : index
    %7 = vector.load %arg3[%c0_3, %c0_4] : memref<256x128xbf16, #tpu.memory_space<vmem>>, vector<256x128xbf16>
    %cst_5 = arith.constant dense<0.000000e+00> : vector<8x128xf32>
    %8 = tpu.matmul %6, %7, %cst_5 {dimension_numbers = #tpu.dot_dimension_numbers<[1], [0], [0], [1], [0, 0, 1, 1], [], []>} : vector<8x256xbf16>, vector<256x128xbf16>, vector<8x128xf32> -> vector<8x128xf32>
    %cst_6 = arith.constant 0.000000e+00 : f32
    %9 = vector.broadcast %cst_6 : f32 to vector<8x128xf32>
    %10 = arith.maximumf %8, %9 : vector<8x128xf32>
    %11 = arith.truncf %10 : vector<8x128xf32> to vector<8x128xbf16>
    %c0_7 = arith.constant 0 : index
    %c0_8 = arith.constant 0 : index
    %12 = vector.load %arg4[%c0_7, %c0_8] : memref<128x128xbf16, #tpu.memory_space<vmem>>, vector<128x128xbf16>
    %cst_9 = arith.constant dense<0.000000e+00> : vector<8x128xf32>
    %13 = tpu.matmul %11, %12, %cst_9 {dimension_numbers = #tpu.dot_dimension_numbers<[1], [0], [0], [1], [0, 0, 1, 1], [], []>} : vector<8x128xbf16>, vector<128x128xbf16>, vector<8x128xf32> -> vector<8x128xf32>
    %c0_10 = arith.constant 0 : index
    %c0_11 = arith.constant 0 : index
    %14 = vector.load %arg5[%c0_10, %c0_11] : memref<1x128xf32, #tpu.memory_space<vmem>>, vector<1x128xf32>
    %15 = vector.broadcast %14 : vector<1x128xf32> to vector<8x128xf32>
    %16 = arith.addf %13, %15 : vector<8x128xf32>
    %cst_12 = arith.constant dense<0xFF800000> : vector<8xf32>
    %17 = vector.multi_reduction <maximumf>, %16, %cst_12 [1] : vector<8x128xf32> to vector<8xf32>
    %18 = vector.shape_cast %17 : vector<8xf32> to vector<8x1xf32>
    %19 = vector.broadcast %18 : vector<8x1xf32> to vector<8x128xf32>
    %20 = arith.subf %16, %19 : vector<8x128xf32>
    %21 = math.exp %20 : vector<8x128xf32>
    %cst_13 = arith.constant dense<0.000000e+00> : vector<8xf32>
    %22 = vector.multi_reduction <add>, %21, %cst_13 [1] : vector<8x128xf32> to vector<8xf32>
    %23 = vector.shape_cast %22 : vector<8xf32> to vector<8x1xf32>
    %24 = tpu.reciprocal %23 {approx = true} : vector<8x1xf32> -> vector<8x1xf32>
    %25 = vector.broadcast %24 : vector<8x1xf32> to vector<8x128xf32>
    %26 = arith.mulf %21, %25 : vector<8x128xf32>
    %27 = arith.mulf %8, %26 : vector<8x128xf32>
    %cst_14 = arith.constant dense<0.000000e+00> : vector<8xf32>
    %28 = vector.multi_reduction <add>, %27, %cst_14 [1] : vector<8x128xf32> to vector<8xf32>
    %29 = vector.shape_cast %28 : vector<8xf32> to vector<8x1xf32>
    %c0_15 = arith.constant 0 : index
    %c0_16 = arith.constant 0 : index
    %30 = vector.load %arg6[%c0_15, %c0_16] : memref<8x1xf32, #tpu.memory_space<vmem>>, vector<8x1xf32>
    tpu.vector_store %arg6[%c0_15, %c0_16], %29 {strides = array<i32>} : memref<8x1xf32, #tpu.memory_space<vmem>>, vector<8x1xf32>,
    return
  }
  func.func @transform_0(%arg0: i32) -> (i32, i32) {
    %c0_i32 = arith.constant 0 : i32
    %c0_i32_0 = arith.constant 0 : i32
    return %arg0, %c0_i32 : i32, i32
  }
  func.func @transform_1(%arg0: i32) -> (i32, i32) {
    %c0_i32 = arith.constant 0 : i32
    %c0_i32_0 = arith.constant 0 : i32
    %c0_i32_1 = arith.constant 0 : i32
    return %c0_i32, %c0_i32_0 : i32, i32
  }
  func.func @transform_2(%arg0: i32) -> (i32, i32) {
    %c0_i32 = arith.constant 0 : i32
    %c0_i32_0 = arith.constant 0 : i32
    %c0_i32_1 = arith.constant 0 : i32
    return %c0_i32, %c0_i32_0 : i32, i32
  }
  func.func @transform_3(%arg0: i32) -> (i32, i32) {
    %c0_i32 = arith.constant 0 : i32
    %c0_i32_0 = arith.constant 0 : i32
    %c0_i32_1 = arith.constant 0 : i32
    return %c0_i32, %c0_i32_0 : i32, i32
  }
  func.func @transform_4(%arg0: i32) -> (i32, i32) {
    %c0_i32 = arith.constant 0 : i32
    %c0_i32_0 = arith.constant 0 : i32
    %c0_i32_1 = arith.constant 0 : i32
    return %c0_i32, %c0_i32_0 : i32, i32
  }
  func.func @transform_5(%arg0: i32) -> (i32, i32) {
    %c0_i32 = arith.constant 0 : i32
    %c0_i32_0 = arith.constant 0 : i32
    return %arg0, %c0_i32 : i32, i32
  }
}

module attributes {stable_mosaic.version = 11 : i64} {
  func.func @afm_kernel(%arg0: i32, %arg1: memref<8x64xbf16, #tpu.memory_space<vmem>>, %arg2: memref<64x512xbf16, #tpu.memory_space<vmem>>, %arg3: memref<256x128xbf16, #tpu.memory_space<vmem>>, %arg4: memref<128x128xbf16, #tpu.memory_space<vmem>>, %arg5: memref<1x128xf32, #tpu.memory_space<vmem>>, %arg6: memref<8x1xf32, #tpu.memory_space<vmem>>) attributes {dimension_semantics = [#tpu.dimension_semantics<parallel>], iteration_bounds = array<i64: 1>, scalar_prefetch = 0 : i64, scratch_operands = 0 : i64, tpu.core_type = #tpu.core_type<tc>, window_params = [{transform_indices = @transform_0, window_bounds = array<i64: 8, 64>}, {pipeline_mode = #tpu.pipeline_mode<synchronous>, transform_indices = @transform_1, window_bounds = array<i64: 64, 512>}, {pipeline_mode = #tpu.pipeline_mode<synchronous>, transform_indices = @transform_2, window_bounds = array<i64: 256, 128>}, {pipeline_mode = #tpu.pipeline_mode<synchronous>, transform_indices = @transform_3, window_bounds = array<i64: 128, 128>}, {pipeline_mode = #tpu.pipeline_mode<synchronous>, transform_indices = @transform_4, window_bounds = array<i64: 1, 128>}, {transform_indices = @transform_5, window_bounds = array<i64: 8, 1>}]} {
    %c0 = arith.constant 0 : index
    %c0_0 = arith.constant 0 : index
    %0 = vector.load %arg1[%c0, %c0_0] : memref<8x64xbf16, #tpu.memory_space<vmem>>, vector<8x64xbf16>
    %c0_1 = arith.constant 0 : index
    %c0_2 = arith.constant 0 : index
    %1 = vector.load %arg2[%c0_1, %c0_2] : memref<64x512xbf16, #tpu.memory_space<vmem>>, vector<64x512xbf16>
    %cst = arith.constant dense<0.000000e+00> : vector<8x512xf32>
    %2 = tpu.matmul %0, %1, %cst {dimension_numbers = #tpu.dot_dimension_numbers<[1], [0], [0], [1], [0, 0, 1, 1], [], []>} : vector<8x64xbf16>, vector<64x512xbf16>, vector<8x512xf32> -> vector<8x512xf32>
    %3 = vector.extract_strided_slice %2 {offsets = [0, 0], sizes = [8, 256], strides = [1, 1]} : vector<8x512xf32> to vector<8x256xf32>
    %4 = vector.extract_strided_slice %2 {offsets = [0, 256], sizes = [8, 256], strides = [1, 1]} : vector<8x512xf32> to vector<8x256xf32>
    %5 = arith.mulf %3, %4 : vector<8x256xf32>
    %6 = arith.truncf %5 : vector<8x256xf32> to vector<8x256xbf16>
    %c0_3 = arith.constant 0 : index
    %c0_4 = arith.constant 0 : index
    %7 = vector.load %arg3[%c0_3, %c0_4] : memref<256x128xbf16, #tpu.memory_space<vmem>>, vector<256x128xbf16>
    %cst_5 = arith.constant dense<0.000000e+00> : vector<8x128xf32>
    %8 = tpu.matmul %6, %7, %cst_5 {dimension_numbers = #tpu.dot_dimension_numbers<[1], [0], [0], [1], [0, 0, 1, 1], [], []>} : vector<8x256xbf16>, vector<256x128xbf16>, vector<8x128xf32> -> vector<8x128xf32>
    %cst_6 = arith.constant 0.000000e+00 : f32
    %9 = vector.broadcast %cst_6 : f32 to vector<8x128xf32>
    %10 = arith.maximumf %8, %9 : vector<8x128xf32>
    %11 = arith.truncf %10 : vector<8x128xf32> to vector<8x128xbf16>
    %c0_7 = arith.constant 0 : index
    %c0_8 = arith.constant 0 : index
    %12 = vector.load %arg4[%c0_7, %c0_8] : memref<128x128xbf16, #tpu.memory_space<vmem>>, vector<128x128xbf16>
    %cst_9 = arith.constant dense<0.000000e+00> : vector<8x128xf32>
    %13 = tpu.matmul %11, %12, %cst_9 {dimension_numbers = #tpu.dot_dimension_numbers<[1], [0], [0], [1], [0, 0, 1, 1], [], []>} : vector<8x128xbf16>, vector<128x128xbf16>, vector<8x128xf32> -> vector<8x128xf32>
    %c0_10 = arith.constant 0 : index
    %c0_11 = arith.constant 0 : index
    %14 = vector.load %arg5[%c0_10, %c0_11] : memref<1x128xf32, #tpu.memory_space<vmem>>, vector<1x128xf32>
    %15 = vector.broadcast %14 : vector<1x128xf32> to vector<8x128xf32>
    %16 = arith.addf %13, %15 : vector<8x128xf32>
    %cst_12 = arith.constant dense<0xFF800000> : vector<8xf32>
    %17 = vector.multi_reduction <maximumf>, %16, %cst_12 [1] : vector<8x128xf32> to vector<8xf32>
    %18 = vector.shape_cast %17 : vector<8xf32> to vector<8x1xf32>
    %19 = vector.broadcast %18 : vector<8x1xf32> to vector<8x128xf32>
    %20 = arith.subf %16, %19 : vector<8x128xf32>
    %21 = math.exp %20 : vector<8x128xf32>
    %cst_13 = arith.constant dense<0.000000e+00> : vector<8xf32>
    %22 = vector.multi_reduction <add>, %21, %cst_13 [1] : vector<8x128xf32> to vector<8xf32>
    %23 = vector.shape_cast %22 : vector<8xf32> to vector<8x1xf32>
    %24 = tpu.reciprocal %23 {approx = true} : vector<8x1xf32> -> vector<8x1xf32>
    %25 = vector.broadcast %24 : vector<8x1xf32> to vector<8x128xf32>
    %26 = arith.mulf %21, %25 : vector<8x128xf32>
    %27 = arith.mulf %8, %26 : vector<8x128xf32>
    %cst_14 = arith.constant dense<0.000000e+00> : vector<8xf32>
    %28 = vector.multi_reduction <add>, %27, %cst_14 [1] : vector<8x128xf32> to vector<8xf32>
    %29 = vector.shape_cast %28 : vector<8xf32> to vector<8x1xf32>
    %c0_15 = arith.constant 0 : index
    %c0_16 = arith.constant 0 : index
    %30 = vector.load %arg6[%c0_15, %c0_16] : memref<8x1xf32, #tpu.memory_space<vmem>>, vector<8x1xf32>
    tpu.vector_store %arg6[%c0_15, %c0_16], %29 {strides = array<i32>} : memref<8x1xf32, #tpu.memory_space<vmem>>, vector<8x1xf32>,
    return
  }
  func.func @transform_0(%arg0: i32) -> (i32, i32) {
    %c0_i32 = arith.constant 0 : i32
    %c0_i32_0 = arith.constant 0 : i32
    return %arg0, %c0_i32 : i32, i32
  }
  func.func @transform_1(%arg0: i32) -> (i32, i32) {
    %c0_i32 = arith.constant 0 : i32
    %c0_i32_0 = arith.constant 0 : i32
    %c0_i32_1 = arith.constant 0 : i32
    return %c0_i32, %c0_i32_0 : i32, i32
  }
  func.func @transform_2(%arg0: i32) -> (i32, i32) {
    %c0_i32 = arith.constant 0 : i32
    %c0_i32_0 = arith.constant 0 : i32
    %c0_i32_1 = arith.constant 0 : i32
    return %c0_i32, %c0_i32_0 : i32, i32
  }
  func.func @transform_3(%arg0: i32) -> (i32, i32) {
    %c0_i32 = arith.constant 0 : i32
    %c0_i32_0 = arith.constant 0 : i32
    %c0_i32_1 = arith.constant 0 : i32
    return %c0_i32, %c0_i32_0 : i32, i32
  }
  func.func @transform_4(%arg0: i32) -> (i32, i32) {
    %c0_i32 = arith.constant 0 : i32
    %c0_i32_0 = arith.constant 0 : i32
    %c0_i32_1 = arith.constant 0 : i32
    return %c0_i32, %c0_i32_0 : i32, i32
  }
  func.func @transform_5(%arg0: i32) -> (i32, i32) {
    %c0_i32 = arith.constant 0 : i32
    %c0_i32_0 = arith.constant 0 : i32
    return %arg0, %c0_i32 : i32, i32
  }
}

</mosaic_0001>

<bundles_post_ra>
// kernel: afm_forward.1
= control target key start
LH: loop header
LB: loop body
LE: loop exit
PB: predicated region body
PF: predicated region fallthrough
CT: control target
= control target key end

     0   :  { %v656_v1 = vmov 0   ;;  %vm118_vm0 = vcmask 523264   ;;  %v657_v34 = vmov 0.0   ;;  %vm658_vm1 = vmmov 0   ;;  %s818_s1 = inlined_call_operand.vmem [shape: bf16[64,512], index: 1, kind: input, shape index: {}]   ;;  %s819_s2 = inlined_call_operand.vmem [shape: bf16[256,128], index: 2, kind: input, shape index: {}]   ;;  %s820_s0 = inlined_call_operand.vmem [shape: bf16[8,64], index: 0, kind: input, shape index: {}]   ;;  %s821_s3 = inlined_call_operand.vmem [shape: bf16[128,128], index: 3, kind: input, shape index: {}]   ;;  %s822_s4 = inlined_call_operand.vmem [shape: f32[1,128], index: 4, kind: input, shape index: {}]   ;;  %s823_s5 = inlined_call_operand.vmem [shape: f32[8,1], index: 5, kind: output, shape index: {}]  }
   0x1   :  { %v604_v0 = vld [vmem:[%s818_s1 + $0x4] ss:$16 sps:$4 sm:$0xff]   ;;  %154 = vmatprep.mubr.bf16.mxu0 %v656_v1  ;;  %195 = vmatprep.mubr.bf16.mxu1 %v656_v1  ;;  %v606_v2 = vld [vmem:[%s818_s1 + $0xc] ss:$16 sps:$4 sm:$0xff]   ;;  %v608_v3 = vld [vmem:[%s818_s1] ss:$16 sps:$4 sm:$0xff]  }
   0x2   :  { %122 = vmatprep.subr.bf16.mxu0 %v604_v0  ;;  %v609_v4 = vld [vmem:[%s818_s1 + $0x8] ss:$16 sps:$4 sm:$0xff]   ;;  %163 = vmatprep.subr.bf16.mxu1 %v606_v2  ;;  %v610_v5 = vld [vmem:[%s818_s1 + $0x24] ss:$16 sps:$4 sm:$0xff]   ;;  %v612_v6 = vld [vmem:[%s818_s1 + $0x2c] ss:$16 sps:$4 sm:$0xff]  }
   0x3   :  { %123 = vmatpush1.bf16.msra.mxu0 %v608_v3  ;;  %164 = vmatpush1.bf16.msra.mxu1 %v609_v4  ;;  %v614_v7 = vld [vmem:[%s818_s1 + $0x20] ss:$16 sps:$4 sm:$0xff]   ;;  %v615_v8 = vld [vmem:[%s818_s1 + $0x28] ss:$16 sps:$4 sm:$0xff]   ;;  %v616_v9 = vld [vmem:[%s818_s1 + $0x44] ss:$16 sps:$4 sm:$0xff]  }
   0x4   :  { %124 = vmatprep.subr.bf16.mxu0 %v610_v5  ;;  %165 = vmatprep.subr.bf16.mxu1 %v612_v6  ;;  %v618_v10 = vld [vmem:[%s818_s1 + $0x4c] ss:$16 sps:$4 sm:$0xff]   ;;  %v620_v11 = vld [vmem:[%s818_s1 + $0x40] ss:$16 sps:$4 sm:$0xff]   ;;  %v621_v12 = vld [vmem:[%s818_s1 + $0x48] ss:$16 sps:$4 sm:$0xff]  }
   0x5   :  { %v622_v13 = vld [vmem:[%s818_s1 + $0x64] ss:$16 sps:$4 sm:$0xff]   ;;  %v624_v14 = vld [vmem:[%s818_s1 + $0x6c] ss:$16 sps:$4 sm:$0xff]   ;;  %v626_v15 = vld [vmem:[%s818_s1 + $0x60] ss:$16 sps:$4 sm:$0xff]  }
   0x6   :  { %v627_v16 = vld [vmem:[%s818_s1 + $0x68] ss:$16 sps:$4 sm:$0xff]   ;;  %v628_v17 = vld [vmem:[%s819_s2 + $0x40] sm:$0xff]   ;;  %v632_v22 = vld [vmem:[%s819_s2 + $0x50] sm:$0xff]   ;;  %vm501_vm2 = vcmask 7168  }
   0x7   :  { %125 = vmatpush1.bf16.msra.mxu0 %v614_v7  ;;  %166 = vmatpush1.bf16.msra.mxu1 %v615_v8  ;;  %v21_v18 = vld [vmem:[%s820_s0] sm:$0xf]  ;;  %v630_v20 = vld [vmem:[%s819_s2 + $0x48] sm:$0xff]   ;;  %v633_v23 = vld [vmem:[%s819_s2 + $0x10] sm:$0xff]  }
   0x8   :  { %126 = vmatprep.subr.bf16.mxu0 %v616_v9  ;;  %167 = vmatprep.subr.bf16.mxu1 %v618_v10  ;;  %v629_v19 = vld [vmem:[%s819_s2] sm:$0xff]   ;;  %v631_v21 = vld [vmem:[%s819_s2 + $0x8] sm:$0xff]   ;;  %v634_v24 = vld [vmem:[%s819_s2 + $0x58] sm:$0xff]  }
   0x9   :  { %v635_v25 = vld [vmem:[%s819_s2 + $0x18] sm:$0xff]   ;;  %v636_v26 = vld [vmem:[%s819_s2 + $0x60] sm:$0xff]   ;;  %v638_v28 = vld [vmem:[%s819_s2 + $0x68] sm:$0xff]  }
   0xa   :  { %v637_v27 = vld [vmem:[%s819_s2 + $0x20] sm:$0xff]   ;;  %v639_v29 = vld [vmem:[%s819_s2 + $0x28] sm:$0xff]   ;;  %v640_v30 = vld [vmem:[%s819_s2 + $0x70] sm:$0xff]  }
   0xb   :  { %127 = vmatpush1.bf16.msra.mxu0 %v620_v11  ;;  %168 = vmatpush1.bf16.msra.mxu1 %v621_v12  ;;  %v641_v31 = vld [vmem:[%s819_s2 + $0x30] sm:$0xff]   ;;  %v642_v32 = vld [vmem:[%s819_s2 + $0x78] sm:$0xff]   ;;  %v644_v35 = vld [vmem:[%s821_s3] sm:$0xff]  }
   0xc   :  { %128 = vmatprep.subr.bf16.mxu0 %v622_v13  ;;  %169 = vmatprep.subr.bf16.mxu1 %v624_v14  ;;  %v643_v33 = vld [vmem:[%s819_s2 + $0x38] sm:$0xff]   ;;  %v645_v36 = vld [vmem:[%s821_s3 + $0x8] sm:$0xff]   ;;  %v646_v37 = vld [vmem:[%s821_s3 + $0x10] sm:$0xff]  }
   0xd   :  { %v647_v38 = vld [vmem:[%s821_s3 + $0x18] sm:$0xff]   ;;  %v648_v39 = vld [vmem:[%s821_s3 + $0x20] sm:$0xff]   ;;  %v649_v40 = vld [vmem:[%s821_s3 + $0x28] sm:$0xff]  }
   0xe   :  { %v650_v53 = vld [vmem:[%s821_s3 + $0x30] sm:$0xff]   ;;  %v651_v54 = vld [vmem:[%s821_s3 + $0x38] sm:$0xff]   ;;  %v541_v62 = vld [vmem:[%s822_s4] ss:$0 sm:$0xff] }
   0xf   :  { %129 = vmatpush1.bf16.msra.mxu0 %v626_v15  ;;  %170 = vmatpush1.bf16.msra.mxu1 %v627_v16 }
  0x10   :  { %550 = vmatprep.subr.bf16.mxu0 %v628_v17  ;;  %581 = vmatprep.subr.bf16.mxu1 %v657_v34 }
  0x12   :  { %523 = vmatmul.mubr.msk.bf16.vlgmr.msra.gmra.mrb[0].mxu0 %vm118_vm0, %v21_v18  ;;  %524 = vmatmul.mubr.msk.bf16.vlgmr.msra.gmra.mrb[0].mxu1 %vm118_vm0, %v21_v18 }
  0x13   :  { %551 = vmatpush3.bf16.msra.mxu0 %v629_v19  ;;  %582 = vmatpush3.bf16.msra.mxu1 %v644_v35 }
  0x14   :  { %552 = vmatprep.subr.bf16.mxu0 %v630_v20  ;;  %583 = vmatprep.subr.bf16.mxu1 %v657_v34 }
  0x15   :  { %597 = vmatprep.mubr.msk.bf16.mxu1 %vm658_vm1, %v657_v34 }
  0x17   :  { %553 = vmatpush3.bf16.msra.mxu0 %v631_v21  ;;  %584 = vmatpush3.bf16.msra.mxu1 %v645_v36 }
  0x18   :  { %554 = vmatprep.subr.bf16.mxu0 %v632_v22  ;;  %585 = vmatprep.subr.bf16.mxu1 %v657_v34 }
  0x1b   :  { %555 = vmatpush3.bf16.msra.mxu0 %v633_v23  ;;  %586 = vmatpush3.bf16.msra.mxu1 %v646_v37 }
  0x1c   :  { %556 = vmatprep.subr.bf16.mxu0 %v634_v24  ;;  %587 = vmatprep.subr.bf16.mxu1 %v657_v34 }
  0x1f   :  { %557 = vmatpush3.bf16.msra.mxu0 %v635_v25  ;;  %588 = vmatpush3.bf16.msra.mxu1 %v647_v38 }
  0x20   :  { %558 = vmatprep.subr.bf16.mxu0 %v636_v26  ;;  %589 = vmatprep.subr.bf16.mxu1 %v657_v34 }
  0x23   :  { %559 = vmatpush3.bf16.msra.mxu0 %v637_v27  ;;  %590 = vmatpush3.bf16.msra.mxu1 %v648_v39 }
  0x24   :  { %560 = vmatprep.subr.bf16.mxu0 %v638_v28  ;;  %591 = vmatprep.subr.bf16.mxu1 %v657_v34 }
  0x27   :  { %561 = vmatpush3.bf16.msra.mxu0 %v639_v29  ;;  %592 = vmatpush3.bf16.msra.mxu1 %v649_v40 }
  0x28   :  { %562 = vmatprep.subr.bf16.mxu0 %v640_v30  ;;  %593 = vmatprep.subr.bf16.mxu1 %v657_v34 }
  0x2b   :  { %563 = vmatpush3.bf16.msra.mxu0 %v641_v31  ;;  %594 = vmatpush3.bf16.msra.mxu1 %v650_v53 }
  0x2c   :  { %564 = vmatprep.subr.bf16.mxu0 %v642_v32  ;;  %595 = vmatprep.subr.bf16.mxu1 %v657_v34 }
  0x2f   :  { %565 = vmatpush3.bf16.msra.mxu0 %v643_v33  ;;  %596 = vmatpush3.bf16.msra.mxu1 %v651_v54 }
  0xe5   :  { %v156_v41 = vpop.f32.mrb[0].mxu0  ;;  %v197_v42 = vpop.f32.mrb[0].mxu1 }
  0xe6   :  { %v204_v43 = vmul.f32 %v197_v42, %v156_v41  ;;  %v158_v44 = vpop.f32.mrb[1].mxu0  ;;  %v199_v45 = vpop.f32.mrb[1].mxu1 }
  0xe7   :  { %v205_v46 = vmul.f32 %v199_v45, %v158_v44  ;;  %v160_v47 = vpop.f32.mrb[2].mxu0  ;;  %v201_v48 = vpop.f32.mrb[2].mxu1 }
  0xe8   :  { %v161_v49 = vpop.f32.mrb[3].mxu0  ;;  %v202_v50 = vpop.f32.mrb[3].mxu1  ;;  %v206_v52 = vpack.c.bf16 %v204_v43, %v204_v43 }
  0xe9   :  { %v207_v51 = vpack.c.bf16 %v205_v46, %v205_v46 }
  0xeb   :  { %368 = vmatprep.mubr.bf16.mxu0 %v207_v51 }
  0xec   :  { %369 = vmatmul.mubr.bf16.vlgmr.msra.gmra.mrb[4].mxu0 %v206_v52 }
 0x1bf   :  { %v566_v55 = vpop.f32.mrb[4].mxu0 }
 0x1c0   :  { %v567_v56 = vpop.f32.mrb[5].mxu0 }
 0x1c1   :  { %v568_v57 = vadd.f32 %v567_v56, %v566_v55  ;;  %v569_v58 = vpop.f32.mrb[6].mxu0 }
 0x1c2   :  { %v570_v59 = vpop.f32.mrb[7].mxu0 }
 0x1c3   :  { %v376_v60 = vmax.f32 %v568_v57, 0.0 }
 0x1c5   :  { %v377_v61 = vpack.c.bf16 %v376_v60, %v376_v60 }
 0x1c7   :  { %598 = vmatmul.mubr.bf16.vlgmr.msra.gmra.mrb[4].mxu1 %v377_v61 }
 0x29a   :  { %v483_v63 = vpop.f32.mrb[4].mxu1 }
 0x29b   :  { %v484_v0 = vadd.f32 %v541_v62, %v483_v63  ;;  %v599_v1 = vpop.f32.mrb[5].mxu1 }
 0x29c   :  { %v486_v2 = vpop.f32.mrb[6].mxu1 }
 0x29d   :  { %489 = vmax.xlane.f32.xlu0 %v484_v0  ;;  %v600_v3 = vpop.f32.mrb[7].mxu1 }
 0x32a   :  { %v490_v4 = vpop.xlane.xlu0 %489 }
 0x32b   :  { %v491_v5 = vsub.f32 %v484_v0, %v490_v4 }
 0x32d   :  { %v492_v6 = vmul.f32 1.442695, %v491_v5 }
 0x32f   :  { %652 = vpow2.f32 %v492_v6 }
 0x339   :  { %v653_v7 = vpop.eup %652 }
 0x33a   :  { %494 = vadd.xlane.f32.xlu0 %v653_v7 }
 0x3c7   :  { %v495_v8 = vpop.xlane.xlu0 %494 }
 0x3c8   :  { %654 = vrcp.f32 %v495_v8 }
 0x3d2   :  { %v655_v9 = vpop.eup %654 }
 0x3d3   :  { %v497_v10 = vmul.f32 %v655_v9, %v653_v7 }
 0x3d5   :  { %v498_v11 = vmul.f32 %v568_v57, %v497_v10 }
 0x3d7   :  { %499 = vadd.xlane.f32.xlu1 %v498_v11 }
 0x464   :  { %v500_v12 = vpop.xlane.xlu1 %499 }
 0x465   :  { %502 = vst.msk [vmem:[%s823_s5] sm:$0xff] %vm501_vm2, %v500_v12 }

// kernel: afm_forward.1
= control target key start
LH: loop header
LB: loop body
LE: loop exit
PB: predicated region body
PF: predicated region fallthrough
CT: control target
= control target key end

     0   :  { %v656_v1 = vmov 0   ;;  %vm118_vm0 = vcmask 523264   ;;  %v657_v34 = vmov 0.0   ;;  %vm658_vm1 = vmmov 0   ;;  %s818_s1 = inlined_call_operand.vmem [shape: bf16[64,512], index: 1, kind: input, shape index: {}]   ;;  %s819_s2 = inlined_call_operand.vmem [shape: bf16[256,128], index: 2, kind: input, shape index: {}]   ;;  %s820_s0 = inlined_call_operand.vmem [shape: bf16[8,64], index: 0, kind: input, shape index: {}]   ;;  %s821_s3 = inlined_call_operand.vmem [shape: bf16[128,128], index: 3, kind: input, shape index: {}]   ;;  %s822_s4 = inlined_call_operand.vmem [shape: f32[1,128], index: 4, kind: input, shape index: {}]   ;;  %s823_s5 = inlined_call_operand.vmem [shape: f32[8,1], index: 5, kind: output, shape index: {}]  }
   0x1   :  { %v604_v0 = vld [vmem:[%s818_s1 + $0x4] ss:$16 sps:$4 sm:$0xff]   ;;  %154 = vmatprep.mubr.bf16.mxu0 %v656_v1  ;;  %195 = vmatprep.mubr.bf16.mxu1 %v656_v1  ;;  %v606_v2 = vld [vmem:[%s818_s1 + $0xc] ss:$16 sps:$4 sm:$0xff]   ;;  %v608_v3 = vld [vmem:[%s818_s1] ss:$16 sps:$4 sm:$0xff]  }
   0x2   :  { %122 = vmatprep.subr.bf16.mxu0 %v604_v0  ;;  %v609_v4 = vld [vmem:[%s818_s1 + $0x8] ss:$16 sps:$4 sm:$0xff]   ;;  %163 = vmatprep.subr.bf16.mxu1 %v606_v2  ;;  %v610_v5 = vld [vmem:[%s818_s1 + $0x24] ss:$16 sps:$4 sm:$0xff]   ;;  %v612_v6 = vld [vmem:[%s818_s1 + $0x2c] ss:$16 sps:$4 sm:$0xff]  }
   0x3   :  { %123 = vmatpush1.bf16.msra.mxu0 %v608_v3  ;;  %164 = vmatpush1.bf16.msra.mxu1 %v609_v4  ;;  %v614_v7 = vld [vmem:[%s818_s1 + $0x20] ss:$16 sps:$4 sm:$0xff]   ;;  %v615_v8 = vld [vmem:[%s818_s1 + $0x28] ss:$16 sps:$4 sm:$0xff]   ;;  %v616_v9 = vld [vmem:[%s818_s1 + $0x44] ss:$16 sps:$4 sm:$0xff]  }
   0x4   :  { %124 = vmatprep.subr.bf16.mxu0 %v610_v5  ;;  %165 = vmatprep.subr.bf16.mxu1 %v612_v6  ;;  %v618_v10 = vld [vmem:[%s818_s1 + $0x4c] ss:$16 sps:$4 sm:$0xff]   ;;  %v620_v11 = vld [vmem:[%s818_s1 + $0x40] ss:$16 sps:$4 sm:$0xff]   ;;  %v621_v12 = vld [vmem:[%s818_s1 + $0x48] ss:$16 sps:$4 sm:$0xff]  }
   0x5   :  { %v622_v13 = vld [vmem:[%s818_s1 + $0x64] ss:$16 sps:$4 sm:$0xff]   ;;  %v624_v14 = vld [vmem:[%s818_s1 + $0x6c] ss:$16 sps:$4 sm:$0xff]   ;;  %v626_v15 = vld [vmem:[%s818_s1 + $0x60] ss:$16 sps:$4 sm:$0xff]  }
   0x6   :  { %v627_v16 = vld [vmem:[%s818_s1 + $0x68] ss:$16 sps:$4 sm:$0xff]   ;;  %v628_v17 = vld [vmem:[%s819_s2 + $0x40] sm:$0xff]   ;;  %v632_v22 = vld [vmem:[%s819_s2 + $0x50] sm:$0xff]   ;;  %vm501_vm2 = vcmask 7168  }
   0x7   :  { %125 = vmatpush1.bf16.msra.mxu0 %v614_v7  ;;  %166 = vmatpush1.bf16.msra.mxu1 %v615_v8  ;;  %v21_v18 = vld [vmem:[%s820_s0] sm:$0xf]  ;;  %v630_v20 = vld [vmem:[%s819_s2 + $0x48] sm:$0xff]   ;;  %v633_v23 = vld [vmem:[%s819_s2 + $0x10] sm:$0xff]  }
   0x8   :  { %126 = vmatprep.subr.bf16.mxu0 %v616_v9  ;;  %167 = vmatprep.subr.bf16.mxu1 %v618_v10  ;;  %v629_v19 = vld [vmem:[%s819_s2] sm:$0xff]   ;;  %v631_v21 = vld [vmem:[%s819_s2 + $0x8] sm:$0xff]   ;;  %v634_v24 = vld [vmem:[%s819_s2 + $0x58] sm:$0xff]  }
   0x9   :  { %v635_v25 = vld [vmem:[%s819_s2 + $0x18] sm:$0xff]   ;;  %v636_v26 = vld [vmem:[%s819_s2 + $0x60] sm:$0xff]   ;;  %v638_v28 = vld [vmem:[%s819_s2 + $0x68] sm:$0xff]  }
   0xa   :  { %v637_v27 = vld [vmem:[%s819_s2 + $0x20] sm:$0xff]   ;;  %v639_v29 = vld [vmem:[%s819_s2 + $0x28] sm:$0xff]   ;;  %v640_v30 = vld [vmem:[%s819_s2 + $0x70] sm:$0xff]  }
   0xb   :  { %127 = vmatpush1.bf16.msra.mxu0 %v620_v11  ;;  %168 = vmatpush1.bf16.msra.mxu1 %v621_v12  ;;  %v641_v31 = vld [vmem:[%s819_s2 + $0x30] sm:$0xff]   ;;  %v642_v32 = vld [vmem:[%s819_s2 + $0x78] sm:$0xff]   ;;  %v644_v35 = vld [vmem:[%s821_s3] sm:$0xff]  }
   0xc   :  { %128 = vmatprep.subr.bf16.mxu0 %v622_v13  ;;  %169 = vmatprep.subr.bf16.mxu1 %v624_v14  ;;  %v643_v33 = vld [vmem:[%s819_s2 + $0x38] sm:$0xff]   ;;  %v645_v36 = vld [vmem:[%s821_s3 + $0x8] sm:$0xff]   ;;  %v646_v37 = vld [vmem:[%s821_s3 + $0x10] sm:$0xff]  }
   0xd   :  { %v647_v38 = vld [vmem:[%s821_s3 + $0x18] sm:$0xff]   ;;  %v648_v39 = vld [vmem:[%s821_s3 + $0x20] sm:$0xff]   ;;  %v649_v40 = vld [vmem:[%s821_s3 + $0x28] sm:$0xff]  }
   0xe   :  { %v650_v53 = vld [vmem:[%s821_s3 + $0x30] sm:$0xff]   ;;  %v651_v54 = vld [vmem:[%s821_s3 + $0x38] sm:$0xff]   ;;  %v541_v62 = vld [vmem:[%s822_s4] ss:$0 sm:$0xff] }
   0xf   :  { %129 = vmatpush1.bf16.msra.mxu0 %v626_v15  ;;  %170 = vmatpush1.bf16.msra.mxu1 %v627_v16 }
  0x10   :  { %550 = vmatprep.subr.bf16.mxu0 %v628_v17  ;;  %581 = vmatprep.subr.bf16.mxu1 %v657_v34 }
  0x12   :  { %523 = vmatmul.mubr.msk.bf16.vlgmr.msra.gmra.mrb[0].mxu0 %vm118_vm0, %v21_v18  ;;  %524 = vmatmul.mubr.msk.bf16.vlgmr.msra.gmra.mrb[0].mxu1 %vm118_vm0, %v21_v18 }
  0x13   :  { %551 = vmatpush3.bf16.msra.mxu0 %v629_v19  ;;  %582 = vmatpush3.bf16.msra.mxu1 %v644_v35 }
  0x14   :  { %552 = vmatprep.subr.bf16.mxu0 %v630_v20  ;;  %583 = vmatprep.subr.bf16.mxu1 %v657_v34 }
  0x15   :  { %597 = vmatprep.mubr.msk.bf16.mxu1 %vm658_vm1, %v657_v34 }
  0x17   :  { %553 = vmatpush3.bf16.msra.mxu0 %v631_v21  ;;  %584 = vmatpush3.bf16.msra.mxu1 %v645_v36 }
  0x18   :  { %554 = vmatprep.subr.bf16.mxu0 %v632_v22  ;;  %585 = vmatprep.subr.bf16.mxu1 %v657_v34 }
  0x1b   :  { %555 = vmatpush3.bf16.msra.mxu0 %v633_v23  ;;  %586 = vmatpush3.bf16.msra.mxu1 %v646_v37 }
  0x1c   :  { %556 = vmatprep.subr.bf16.mxu0 %v634_v24  ;;  %587 = vmatprep.subr.bf16.mxu1 %v657_v34 }
  0x1f   :  { %557 = vmatpush3.bf16.msra.mxu0 %v635_v25  ;;  %588 = vmatpush3.bf16.msra.mxu1 %v647_v38 }
  0x20   :  { %558 = vmatprep.subr.bf16.mxu0 %v636_v26  ;;  %589 = vmatprep.subr.bf16.mxu1 %v657_v34 }
  0x23   :  { %559 = vmatpush3.bf16.msra.mxu0 %v637_v27  ;;  %590 = vmatpush3.bf16.msra.mxu1 %v648_v39 }
  0x24   :  { %560 = vmatprep.subr.bf16.mxu0 %v638_v28  ;;  %591 = vmatprep.subr.bf16.mxu1 %v657_v34 }
  0x27   :  { %561 = vmatpush3.bf16.msra.mxu0 %v639_v29  ;;  %592 = vmatpush3.bf16.msra.mxu1 %v649_v40 }
  0x28   :  { %562 = vmatprep.subr.bf16.mxu0 %v640_v30  ;;  %593 = vmatprep.subr.bf16.mxu1 %v657_v34 }
  0x2b   :  { %563 = vmatpush3.bf16.msra.mxu0 %v641_v31  ;;  %594 = vmatpush3.bf16.msra.mxu1 %v650_v53 }
  0x2c   :  { %564 = vmatprep.subr.bf16.mxu0 %v642_v32  ;;  %595 = vmatprep.subr.bf16.mxu1 %v657_v34 }
  0x2f   :  { %565 = vmatpush3.bf16.msra.mxu0 %v643_v33  ;;  %596 = vmatpush3.bf16.msra.mxu1 %v651_v54 }
  0xe5   :  { %v156_v41 = vpop.f32.mrb[0].mxu0  ;;  %v197_v42 = vpop.f32.mrb[0].mxu1 }
  0xe6   :  { %v204_v43 = vmul.f32 %v197_v42, %v156_v41  ;;  %v158_v44 = vpop.f32.mrb[1].mxu0  ;;  %v199_v45 = vpop.f32.mrb[1].mxu1 }
  0xe7   :  { %v205_v46 = vmul.f32 %v199_v45, %v158_v44  ;;  %v160_v47 = vpop.f32.mrb[2].mxu0  ;;  %v201_v48 = vpop.f32.mrb[2].mxu1 }
  0xe8   :  { %v161_v49 = vpop.f32.mrb[3].mxu0  ;;  %v202_v50 = vpop.f32.mrb[3].mxu1  ;;  %v206_v52 = vpack.c.bf16 %v204_v43, %v204_v43 }
  0xe9   :  { %v207_v51 = vpack.c.bf16 %v205_v46, %v205_v46 }
  0xeb   :  { %368 = vmatprep.mubr.bf16.mxu0 %v207_v51 }
  0xec   :  { %369 = vmatmul.mubr.bf16.vlgmr.msra.gmra.mrb[4].mxu0 %v206_v52 }
 0x1bf   :  { %v566_v55 = vpop.f32.mrb[4].mxu0 }
 0x1c0   :  { %v567_v56 = vpop.f32.mrb[5].mxu0 }
 0x1c1   :  { %v568_v57 = vadd.f32 %v567_v56, %v566_v55  ;;  %v569_v58 = vpop.f32.mrb[6].mxu0 }
 0x1c2   :  { %v570_v59 = vpop.f32.mrb[7].mxu0 }
 0x1c3   :  { %v376_v60 = vmax.f32 %v568_v57, 0.0 }
 0x1c5   :  { %v377_v61 = vpack.c.bf16 %v376_v60, %v376_v60 }
 0x1c7   :  { %598 = vmatmul.mubr.bf16.vlgmr.msra.gmra.mrb[4].mxu1 %v377_v61 }
 0x29a   :  { %v483_v63 = vpop.f32.mrb[4].mxu1 }
 0x29b   :  { %v484_v0 = vadd.f32 %v541_v62, %v483_v63  ;;  %v599_v1 = vpop.f32.mrb[5].mxu1 }
 0x29c   :  { %v486_v2 = vpop.f32.mrb[6].mxu1 }
 0x29d   :  { %489 = vmax.xlane.f32.xlu0 %v484_v0  ;;  %v600_v3 = vpop.f32.mrb[7].mxu1 }
 0x32a   :  { %v490_v4 = vpop.xlane.xlu0 %489 }
 0x32b   :  { %v491_v5 = vsub.f32 %v484_v0, %v490_v4 }
 0x32d   :  { %v492_v6 = vmul.f32 1.442695, %v491_v5 }
 0x32f   :  { %652 = vpow2.f32 %v492_v6 }
 0x339   :  { %v653_v7 = vpop.eup %652 }
 0x33a   :  { %494 = vadd.xlane.f32.xlu0 %v653_v7 }
 0x3c7   :  { %v495_v8 = vpop.xlane.xlu0 %494 }
 0x3c8   :  { %654 = vrcp.f32 %v495_v8 }
 0x3d2   :  { %v655_v9 = vpop.eup %654 }
 0x3d3   :  { %v497_v10 = vmul.f32 %v655_v9, %v653_v7 }
 0x3d5   :  { %v498_v11 = vmul.f32 %v568_v57, %v497_v10 }
 0x3d7   :  { %499 = vadd.xlane.f32.xlu1 %v498_v11 }
 0x464   :  { %v500_v12 = vpop.xlane.xlu1 %499 }
 0x465   :  { %502 = vst.msk [vmem:[%s823_s5] sm:$0xff] %vm501_vm2, %v500_v12 }

</bundles_post_ra>
